<compile_context>
chip_gen: v7x
topology: tpu7x:2x2x1
jax: 0.10.0
libtpu: 0.0.40
codegen_flags: <defaults>
</compile_context>

<pallas_src>
import functools

import jax
import jax.numpy as jnp
from jax.experimental import pallas as pl
from jax.experimental.pallas import tpu as pltpu


# Hidden sizes fixed by the PyTorch module.
H1, H2, H3 = 64, 32, 16
# Row offsets of each layer's [W | b] block inside the packed parameter array.
_R1, _R2, _R3, _R4 = 0, H1, H1 + H2, H1 + H2 + H3          # 0, 64, 96, 112
_PACK_ROWS = 128                                            # >= 113, multiple of 8


def _round_up(x, m):
    return (x + m - 1) // m * m


def critic_kernel(xa_ref, p_ref, out_ref, *, S, A):
    """One batch tile (batch on the lane axis).

    xa_ref : (S + A, TB)   -- [x ; a], batch on lanes
    p_ref  : (128, PC)     -- packed params, resident across grid steps
    out_ref: (1, TB)       -- lane-dense Q-value row
    """
    x = xa_ref[0:S, :]                                # (S, TB)
    a = xa_ref[S:S + A, :]                            # (A, TB)

    # lin1 + relu: (64, S) @ (S, TB) + (64, 1)
    w1 = p_ref[_R1:_R1 + H1, 0:S]
    b1 = p_ref[_R1:_R1 + H1, S:S + 1]
    h1 = jnp.dot(w1, x, preferred_element_type=jnp.float32)
    h1 = jnp.maximum(h1 + b1, 0.0)

    # lin2 + relu on cat([h1, a], 1), done as split contributions.
    w2x = p_ref[_R2:_R2 + H2, 0:H1]                   # (32, 64)
    w2a = p_ref[_R2:_R2 + H2, H1:H1 + A]              # (32, A)
    b2 = p_ref[_R2:_R2 + H2, H1 + A:H1 + A + 1]
    h2 = jnp.dot(w2x, h1, preferred_element_type=jnp.float32)
    if A == 1:
        # (32,1) * (1,TB) outer product on the VPU instead of a K=1 MXU matmul.
        h2 = h2 + w2a * a
    else:
        h2 = h2 + jnp.dot(w2a, a, preferred_element_type=jnp.float32)
    h2 = jnp.maximum(h2 + b2, 0.0)

    # lin3 + relu: (16, 32) @ (32, TB) + (16, 1)
    w3 = p_ref[_R3:_R3 + H3, 0:H2]
    b3 = p_ref[_R3:_R3 + H3, H2:H2 + 1]
    h3 = jnp.dot(w3, h2, preferred_element_type=jnp.float32)
    h3 = jnp.maximum(h3 + b3, 0.0)

    # lin4 (no activation): (1, 16) @ (16, TB) + (1, 1)
    w4 = p_ref[_R4:_R4 + 1, 0:H3]
    b4 = p_ref[_R4:_R4 + 1, H3:H3 + 1]
    q = jnp.dot(w4, h3, preferred_element_type=jnp.float32) + b4
    out_ref[...] = q                                  # lane-dense store


@jax.jit
def critic_forward(x, a, packed_params):
    """x: (B, state_size) f32, a: (B, action_size) f32 -> (B, 1) f32."""
    B, S = x.shape
    A = a.shape[1]
    PR, PC = packed_params.shape

    # Batch tile: multiple of 128 lanes, capped at 512 columns of batch.
    TB = min(512, _round_up(max(B, 1), 128))
    B_pad = _round_up(B, TB)

    xa = jnp.concatenate([x, a], axis=1).astype(jnp.float32)       # (B, S+A)
    if B_pad != B:
        xa = jnp.pad(xa, ((0, B_pad - B), (0, 0)))
    xa_t = xa.T                                                    # (S+A, B_pad)

    grid = (B_pad // TB,)
    kernel = functools.partial(critic_kernel, S=S, A=A)

    out_t = pl.pallas_call(
        kernel,
        out_shape=jax.ShapeDtypeStruct((1, B_pad), jnp.float32),
        grid_spec=pltpu.PrefetchScalarGridSpec(
            num_scalar_prefetch=0,
            grid=grid,
            in_specs=[
                pl.BlockSpec((S + A, TB), lambda i: (0, i)),       # batch tile
                pl.BlockSpec((PR, PC), lambda i: (0, 0)),          # resident params
            ],
            out_specs=pl.BlockSpec((1, TB), lambda i: (0, i)),
        ),
        compiler_params=pltpu.CompilerParams(
            dimension_semantics=("parallel",),                     # v7x: 2 TCs
            vmem_limit_bytes=32 * 1024 * 1024,
        ),
        cost_estimate=pl.CostEstimate(
            flops=2 * B_pad * (S * H1 + H1 * H2 + A * H2 + H2 * H3 + H3),
            transcendentals=0,
            bytes_accessed=(B_pad * (S + A) + B_pad) * 4 + PR * PC * 4,
        ),
    )(xa_t, packed_params)

    return out_t[0, :B].reshape(B, 1)


def init_params(key, state_size, action_size):
    """PyTorch nn.Linear default init: U(-1/sqrt(fan_in), 1/sqrt(fan_in)).
    Weights kept in PyTorch (out, in) layout; biases as (out,) vectors."""
    def linear(k, fan_in, fan_out):
        kw, kb = jax.random.split(k)
        bound = 1.0 / jnp.sqrt(jnp.float32(fan_in))
        w = jax.random.uniform(kw, (fan_out, fan_in), jnp.float32, -bound, bound)
        b = jax.random.uniform(kb, (fan_out,), jnp.float32, -bound, bound)
        return w, b

    k1, k2, k3, k4 = jax.random.split(key, 4)
    w1, b1 = linear(k1, state_size, H1)                 # lin1
    w2, b2 = linear(k2, H1 + action_size, H2)           # lin2 (on concat)
    w3, b3 = linear(k3, H2, H3)                         # lin3
    w4, b4 = linear(k4, H3, 1)                          # lin4
    return (w1, b1, w2, b2, w3, b3, w4, b4)


def pack_params(params, state_size, action_size):
    """Pack all weights + biases into one zero-padded (128, PC) f32 array so
    the kernel sees a single resident VMEM block (one DMA)."""
    w1, b1, w2, b2, w3, b3, w4, b4 = params
    S, A = state_size, action_size
    PC = _round_up(max(S + 1, H1 + A + 1, H2 + 1, H3 + 1), 128)
    P = jnp.zeros((_PACK_ROWS, PC), jnp.float32)
    P = P.at[_R1:_R1 + H1, 0:S].set(w1)
    P = P.at[_R1:_R1 + H1, S].set(b1)
    P = P.at[_R2:_R2 + H2, 0:H1].set(w2[:, :H1])
    P = P.at[_R2:_R2 + H2, H1:H1 + A].set(w2[:, H1:])
    P = P.at[_R2:_R2 + H2, H1 + A].set(b2)
    P = P.at[_R3:_R3 + H3, 0:H2].set(w3)
    P = P.at[_R3:_R3 + H3, H2].set(b3)
    P = P.at[_R4, 0:H3].set(w4[0])
    P = P.at[_R4, H3].set(b4[0])
    return P


def reference_forward(x, a, params):
    w1, b1, w2, b2, w3, b3, w4, b4 = params
    h1 = jax.nn.relu(x @ w1.T + b1)
    h2 = jax.nn.relu(jnp.concatenate([h1, a], axis=1) @ w2.T + b2)
    h3 = jax.nn.relu(h2 @ w3.T + b3)
    return h3 @ w4.T + b4


if __name__ == "__main__":
    key = jax.random.PRNGKey(0)
    k_x, k_a, k_p, k_x2, k_a2 = jax.random.split(key, 5)

    state_size = 3    # Pendulum-v1 observation dim
    action_size = 1   # Pendulum-v1 action dim
    params = init_params(k_p, state_size, action_size)
    packed = pack_params(params, state_size, action_size)

    # Small demo batch.
    batch = 8
    x = jax.random.normal(k_x, (batch, state_size), jnp.float32)
    a = jax.random.normal(k_a, (batch, action_size), jnp.float32)
    out = jax.block_until_ready(critic_forward(x, a, packed))
    ref = reference_forward(x, a, params)
    assert out.shape == (batch, 1)
    assert jnp.allclose(out, ref, atol=1e-5, rtol=1e-5), "mismatch vs reference (B=8)"

    # Larger batch exercising zero-padding + a multi-step parallel grid.
    batch2 = 1100
    x2 = jax.random.normal(k_x2, (batch2, state_size), jnp.float32)
    a2 = jax.random.normal(k_a2, (batch2, action_size), jnp.float32)
    out2 = jax.block_until_ready(critic_forward(x2, a2, packed))
    ref2 = reference_forward(x2, a2, params)
    assert out2.shape == (batch2, 1)
    assert jnp.allclose(out2, ref2, atol=1e-4, rtol=1e-4), "mismatch vs reference (B=1100)"

    print("KERNEL_OK")
</pallas_src>

<mosaic_0001>
module attributes {stable_mosaic.version = 11 : i64} {
  func.func @critic_kernel(%arg0: i32, %arg1: memref<4x128xf32, #tpu.memory_space<vmem>>, %arg2: memref<128x128xf32, #tpu.memory_space<vmem>>, %arg3: memref<1x128xf32, #tpu.memory_space<vmem>>) attributes {dimension_semantics = [#tpu.dimension_semantics<parallel>], iteration_bounds = array<i64: 1>, scalar_prefetch = 0 : i64, scratch_operands = 0 : i64, tpu.core_type = #tpu.core_type<tc>, window_params = [{transform_indices = @transform_0, window_bounds = array<i64: 4, 128>}, {pipeline_mode = #tpu.pipeline_mode<synchronous>, transform_indices = @transform_1, window_bounds = array<i64: 128, 128>}, {transform_indices = @transform_2, window_bounds = array<i64: 1, 128>}]} {
    %c0 = arith.constant 0 : index
    %c0_0 = arith.constant 0 : index
    %0 = vector.load %arg1[%c0, %c0_0] : memref<4x128xf32, #tpu.memory_space<vmem>>, vector<3x128xf32>
    %c3 = arith.constant 3 : index
    %c0_1 = arith.constant 0 : index
    %1 = vector.load %arg1[%c3, %c0_1] : memref<4x128xf32, #tpu.memory_space<vmem>>, vector<1x128xf32>
    %c0_2 = arith.constant 0 : index
    %c0_3 = arith.constant 0 : index
    %2 = vector.load %arg2[%c0_2, %c0_3] : memref<128x128xf32, #tpu.memory_space<vmem>>, vector<64x3xf32>
    %c0_4 = arith.constant 0 : index
    %c3_5 = arith.constant 3 : index
    %3 = vector.load %arg2[%c0_4, %c3_5] : memref<128x128xf32, #tpu.memory_space<vmem>>, vector<64x1xf32>
    %cst = arith.constant dense<0.000000e+00> : vector<64x128xf32>
    %4 = tpu.matmul %2, %0, %cst {dimension_numbers = #tpu.dot_dimension_numbers<[1], [0], [0], [1], [0, 0, 1, 1], [], []>} : vector<64x3xf32>, vector<3x128xf32>, vector<64x128xf32> -> vector<64x128xf32>
    %5 = vector.broadcast %3 : vector<64x1xf32> to vector<64x128xf32>
    %6 = arith.addf %4, %5 : vector<64x128xf32>
    %cst_6 = arith.constant 0.000000e+00 : f32
    %7 = vector.broadcast %cst_6 : f32 to vector<64x128xf32>
    %8 = arith.maximumf %6, %7 : vector<64x128xf32>
    %c64 = arith.constant 64 : index
    %c0_7 = arith.constant 0 : index
    %9 = vector.load %arg2[%c64, %c0_7] : memref<128x128xf32, #tpu.memory_space<vmem>>, vector<32x64xf32>
    %c64_8 = arith.constant 64 : index
    %c64_9 = arith.constant 64 : index
    %10 = vector.load %arg2[%c64_8, %c64_9] : memref<128x128xf32, #tpu.memory_space<vmem>>, vector<32x1xf32>
    %c64_10 = arith.constant 64 : index
    %c65 = arith.constant 65 : index
    %11 = vector.load %arg2[%c64_10, %c65] : memref<128x128xf32, #tpu.memory_space<vmem>>, vector<32x1xf32>
    %cst_11 = arith.constant dense<0.000000e+00> : vector<32x128xf32>
    %12 = tpu.matmul %9, %8, %cst_11 {dimension_numbers = #tpu.dot_dimension_numbers<[1], [0], [0], [1], [0, 0, 1, 1], [], []>} : vector<32x64xf32>, vector<64x128xf32>, vector<32x128xf32> -> vector<32x128xf32>
    %13 = vector.broadcast %10 : vector<32x1xf32> to vector<32x128xf32>
    %14 = vector.broadcast %1 : vector<1x128xf32> to vector<32x128xf32>
    %15 = arith.mulf %13, %14 : vector<32x128xf32>
    %16 = arith.addf %12, %15 : vector<32x128xf32>
    %17 = vector.broadcast %11 : vector<32x1xf32> to vector<32x128xf32>
    %18 = arith.addf %16, %17 : vector<32x128xf32>
    %cst_12 = arith.constant 0.000000e+00 : f32
    %19 = vector.broadcast %cst_12 : f32 to vector<32x128xf32>
    %20 = arith.maximumf %18, %19 : vector<32x128xf32>
    %c96 = arith.constant 96 : index
    %c0_13 = arith.constant 0 : index
    %21 = vector.load %arg2[%c96, %c0_13] : memref<128x128xf32, #tpu.memory_space<vmem>>, vector<16x32xf32>
    %c96_14 = arith.constant 96 : index
    %c32 = arith.constant 32 : index
    %22 = vector.load %arg2[%c96_14, %c32] : memref<128x128xf32, #tpu.memory_space<vmem>>, vector<16x1xf32>
    %cst_15 = arith.constant dense<0.000000e+00> : vector<16x128xf32>
    %23 = tpu.matmul %21, %20, %cst_15 {dimension_numbers = #tpu.dot_dimension_numbers<[1], [0], [0], [1], [0, 0, 1, 1], [], []>} : vector<16x32xf32>, vector<32x128xf32>, vector<16x128xf32> -> vector<16x128xf32>
    %24 = vector.broadcast %22 : vector<16x1xf32> to vector<16x128xf32>
    %25 = arith.addf %23, %24 : vector<16x128xf32>
    %cst_16 = arith.constant 0.000000e+00 : f32
    %26 = vector.broadcast %cst_16 : f32 to vector<16x128xf32>
    %27 = arith.maximumf %25, %26 : vector<16x128xf32>
    %c112 = arith.constant 112 : index
    %c0_17 = arith.constant 0 : index
    %28 = vector.load %arg2[%c112, %c0_17] : memref<128x128xf32, #tpu.memory_space<vmem>>, vector<1x16xf32>
    %c112_18 = arith.constant 112 : index
    %c16 = arith.constant 16 : index
    %29 = vector.load %arg2[%c112_18, %c16] : memref<128x128xf32, #tpu.memory_space<vmem>>, vector<1x1xf32>
    %cst_19 = arith.constant dense<0.000000e+00> : vector<1x128xf32>
    %30 = tpu.matmul %28, %27, %cst_19 {dimension_numbers = #tpu.dot_dimension_numbers<[1], [0], [0], [1], [0, 0, 1, 1], [], []>} : vector<1x16xf32>, vector<16x128xf32>, vector<1x128xf32> -> vector<1x128xf32>
    %31 = vector.broadcast %29 : vector<1x1xf32> to vector<1x128xf32>
    %32 = arith.addf %30, %31 : vector<1x128xf32>
    %c0_20 = arith.constant 0 : index
    %c0_21 = arith.constant 0 : index
    %33 = vector.load %arg3[%c0_20, %c0_21] : memref<1x128xf32, #tpu.memory_space<vmem>>, vector<1x128xf32>
    tpu.vector_store %arg3[%c0_20, %c0_21], %32 {strides = array<i32>} : memref<1x128xf32, #tpu.memory_space<vmem>>, vector<1x128xf32>,
    return
  }
  func.func @transform_0(%arg0: i32) -> (i32, i32) {
    %c0_i32 = arith.constant 0 : i32
    %c0_i32_0 = arith.constant 0 : i32
    return %c0_i32, %arg0 : i32, i32
  }
  func.func @transform_1(%arg0: i32) -> (i32, i32) {
    %c0_i32 = arith.constant 0 : i32
    %c0_i32_0 = arith.constant 0 : i32
    %c0_i32_1 = arith.constant 0 : i32
    return %c0_i32, %c0_i32_0 : i32, i32
  }
  func.func @transform_2(%arg0: i32) -> (i32, i32) {
    %c0_i32 = arith.constant 0 : i32
    %c0_i32_0 = arith.constant 0 : i32
    return %c0_i32, %arg0 : i32, i32
  }
}

</mosaic_0001>

<bundles_post_ra>
// kernel: critic_forward.1
= control target key start
LH: loop header
LB: loop body
LE: loop exit
PB: predicated region body
PF: predicated region fallthrough
CT: control target
= control target key end

     0   :  { %7 = vsyncpa [#allocation3], 0  ;;  %s711_s9 = smov [#allocation2]   ;;  %s772_s0 = inlined_call_operand.vmem [shape: f32[4,128], index: 0, kind: input, shape index: {}]   ;;  %s773_s1 = inlined_call_operand.hbm [shape: f32[128,128], index: 1, kind: input, shape index: {}]   ;;  %s774_s2 = inlined_call_operand.vmem [shape: f32[1,128], index: 2, kind: output, shape index: {}]  }
   0x1   :  { %s15_s10 = sshll.u32 %s711_s9, 4  ;;  %s687_s13 = scalar_lea.hbm %s773_s1, 2048  ;;  %s16_s10 = int_to_ptr.vmem [resolvable:$true] %s15_s10 }
   0x2   :  { %p688_p0 = scmp.ne.s32.totalorder %s773_s1, %s687_s13  ;;  %p691_p1 = scmp.lt.u32.totalorder %s687_s13, %s773_s1 }
   0x4   :  { %p693_p2 = pnand %p691_p1, %p688_p0 }
   0x6   :  { %696 = shalt.err (!%p693_p2)
}
   0x7   :  { %s697_s18 = scalar_lea.vmem %s16_s10, 2048  ;;  %p702_p4 = scmp.lt.s32.totalorder %s16_s10, %s16_s10 }
   0x8   :  { %p698_p3 = scmp.ne.s32.totalorder %s16_s10, %s697_s18  ;;  %p703_p5 = scmp.lt.s32.totalorder %s697_s18, %s697_s18 }
   0xa   :  { %p704_p6 = por %p703_p5, %p702_p4 }
   0xc   :  { %p705_p7 = pnand %p704_p6, %p698_p3 }
   0xe   :  { %708 = shalt.err (!%p705_p7)
}
   0xf   :  { %s712_s19 = smov 128   ;;  %s713_s20 = smov 8  }
  0x10   :  { %21 = dma.hbm_to_vmem [thread:$0]  %s773_s1, 2048, %s16_s10, [#allocation3], %s712_s19, %s712_s19, %s713_s20  }
  0x11   :  { %709 = dma.done.wait [#allocation3], 2048  }
  0x12   :  { %710 = vsyncadd [#allocation3], 4294965248  ;;  %v714_v0 = vmov 3   ;;  %vm92_vm0 = vcmask 1042432   ;;  %vm75_vm1 = vcmask 23552   ;;  %v27_v2 = vld [vmem:[#allocation2] sm:$0xff] }
  0x13   :  { %677 = vset.pattern.permute.xlu0 %v714_v0  ;;  %678 = vset.pattern.permute.xlu1 %v714_v0  ;;  %v25_v1 = vld [vmem:[%s772_s0] sm:$0x7]  ;;  %v28_v3 = vld [vmem:[#allocation2 + $0x8] sm:$0xff]  ;;  %v29_v4 = vld [vmem:[#allocation2 + $0x10] sm:$0xff]  ;;  %vm241_vm2 = vcmask 523264   ;;  %v715_v12 = vmov 64  }
  0x14   :  { %585 = vmatprep.subr.msk.mxu0 %vm92_vm0, %v25_v1  ;;  %587 = vmatprep.mubr.msk.f32.mxu0 %vm75_vm1, %v27_v2  ;;  %v30_v5 = vld [vmem:[#allocation2 + $0x18] sm:$0xff]  ;;  %v31_v6 = vld [vmem:[#allocation2 + $0x20] sm:$0xff]  ;;  %v32_v7 = vld [vmem:[#allocation2 + $0x28] sm:$0xff]  ;;  %v716_v15 = vmov 65   ;;  %vm371_vm3 = vcmask 261120   ;;  %v717_v54 = vmov 32  }
  0x15   :  { %586 = vmatpush3.msk.msra.mxu0 %vm92_vm0, %v25_v1  ;;  %37 = vperm.xlu0 %677, %v27_v2   ;;  %v33_v8 = vld [vmem:[#allocation2 + $0x30] sm:$0xff]  ;;  %v34_v9 = vld [vmem:[#allocation2 + $0x38] sm:$0xff]  ;;  %v209_v10 = vld [vmem:[#allocation2 + $0x40] sm:$0xff]  ;;  %vm719_vm4 = vmmov 0   ;;  %vm459_vm5 = vcmask 130048  }
  0x16   :  { %588 = vmatmul.mubr.msk.f32.vlgmr.msra.gmra.mrb[0].mxu0 %vm75_vm1, %v28_v3  ;;  %47 = vperm.xlu1 %678, %v29_v4   ;;  %v210_v11 = vld [vmem:[#allocation2 + $0x48] sm:$0xff]  ;;  %v211_v13 = vld [vmem:[#allocation2 + $0x50] sm:$0xff]  ;;  %v212_v14 = vld [vmem:[#allocation2 + $0x58] sm:$0xff] }
  0x17   :  { %590 = vmatprep.mubr.msk.f32.mxu0 %vm75_vm1, %v29_v4  ;;  %615 = vmatprep.mubr.msk.f32.mxu1 %vm241_vm2, %v209_v10  ;;  %v359_v52 = vld [vmem:[#allocation2 + $0x60] sm:$0xff]  ;;  %v360_v53 = vld [vmem:[#allocation2 + $0x68] sm:$0xff] }
  0x18   :  { %v547_v59 = vld [vmem:[%s772_s0 + $0x3] ss:$0 sm:$0xff] }
  0x19   :  { %42 = vperm.xlu0 %677, %v28_v3  }
  0x1a   :  { %591 = vmatmul.mubr.msk.f32.gmra.mrb[2].mxu0 %vm75_vm1, %v30_v5  ;;  %52 = vperm.xlu1 %678, %v30_v5  }
  0x1b   :  { %593 = vmatprep.mubr.msk.f32.mxu0 %vm75_vm1, %v31_v6 }
  0x1d   :  { %57 = vperm.xlu0 %677, %v31_v6  }
  0x1e   :  { %594 = vmatmul.mubr.msk.f32.gmra.mrb[4].mxu0 %vm75_vm1, %v32_v7  ;;  %62 = vperm.xlu1 %678, %v32_v7  }
  0x1f   :  { %596 = vmatprep.mubr.msk.f32.mxu0 %vm75_vm1, %v33_v8 }
  0x21   :  { %67 = vperm.xlu0 %677, %v33_v8  }
  0x22   :  { %597 = vmatmul.mubr.msk.f32.gmra.mrb[6].mxu0 %vm75_vm1, %v34_v9  ;;  %72 = vperm.xlu1 %678, %v34_v9  }
  0x23   :  { %629 = vmatprep.mubr.msk.f32.mxu0 %vm371_vm3, %v359_v52 }
  0x25   :  { %679 = vset.pattern.permute.xlu0 %v715_v12 }
  0x26   :  { %680 = vset.pattern.permute.xlu1 %v715_v12  ;;  %215 = vperm.xlu0 %679, %v209_v10  }
  0x27   :  { %220 = vperm.xlu1 %680, %v210_v11  }
  0x2a   :  { %230 = vperm.xlu0 %679, %v212_v14  }
  0x2b   :  { %225 = vperm.xlu1 %680, %v211_v13  }
  0x2e   :  { %682 = vset.pattern.permute.xlu0 %v716_v15 }
  0x2f   :  { %681 = vset.pattern.permute.xlu1 %v716_v15  ;;  %340 = vperm.xlu0 %682, %v210_v11  }
  0x30   :  { %336 = vperm.xlu1 %681, %v209_v10  }
  0x33   :  { %683 = vset.pattern.permute.xlu0 %v717_v54 }
  0x34   :  { %344 = vperm.xlu1 %681, %v211_v13   ;;  %363 = vperm.xlu0 %683, %v359_v52  }
  0x38   :  { %348 = vperm.xlu1 %681, %v212_v14  }
  0x3c   :  { %684 = vset.pattern.permute.xlu1 %v717_v54 }
  0x3d   :  { %368 = vperm.xlu1 %684, %v360_v53  }
  0x94   :  { %v38_v16 = vpop.permute.xlu0 %37 }
  0x95   :  { %v48_v17 = vpop.permute.xlu1 %47 }
  0x98   :  { %v43_v18 = vpop.permute.xlu0 %42 }
  0x99   :  { %v53_v19 = vpop.permute.xlu1 %52 }
  0x9c   :  { %v58_v32 = vpop.permute.xlu0 %57 }
  0x9d   :  { %v63_v29 = vpop.permute.xlu1 %62 }
  0xa0   :  { %v68_v44 = vpop.permute.xlu0 %67 }
  0xa1   :  { %v73_v41 = vpop.permute.xlu1 %72 }
  0xa5   :  { %v216_v57 = vpop.permute.xlu0 %215 }
  0xa6   :  { %v221_v55 = vpop.permute.xlu1 %220  ;;  %v237_v63 = vmul.f32 %v547_v59, %v216_v57 }
  0xa7   :  { %v238_v61 = vmul.f32 %v547_v59, %v221_v55 }
  0xa9   :  { %v231_v60 = vpop.permute.xlu0 %230 }
  0xaa   :  { %v226_v56 = vpop.permute.xlu1 %225  ;;  %v240_v5 = vmul.f32 %v547_v59, %v231_v60 }
  0xab   :  { %v239_v7 = vmul.f32 %v547_v59, %v226_v56 }
  0xae   :  { %v341_v1 = vpop.permute.xlu0 %340 }
  0xaf   :  { %v337_v58 = vpop.permute.xlu1 %336 }
  0xb3   :  { %v345_v62 = vpop.permute.xlu1 %344 }
  0xe9   :  { %v589_v20 = vpop.f32.mrb[0].mxu0 }
  0xea   :  { %v168_v21 = vadd.f32 %v589_v20, %v43_v18  ;;  %v162_v22 = vpop.f32.mrb[1].mxu0 }
  0xeb   :  { %v163_v23 = vadd.f32 %v162_v22, %v38_v16  ;;  %v718_v22 = vmov 0.0|0.0  }
  0xec   :  { %v202_v24 = vmax.f32 %v168_v21, 0.0 }
  0xed   :  { %v201_v25 = vmax.f32 %v163_v23, 0.0  ;;  %v592_v26 = vpop.f32.mrb[2].mxu0  ;;  %v720_v23 = vmov 0.0  }
  0xee   :  { %v178_v27 = vadd.f32 %v592_v26, %v53_v19  ;;  %v172_v28 = vpop.f32.mrb[3].mxu0 }
  0xef   :  { %v173_v30 = vadd.f32 %v172_v28, %v48_v17  ;;  %v639_v31 = vpack.c.bf16 %v202_v24, %v201_v25  ;;  %v453_v24 = vld [vmem:[#allocation2 + $0x70] sm:$0x1]  ;;  %v721_v25 = vmov 16  }
  0xf0   :  { %v204_v33 = vmax.f32 %v178_v27, 0.0  ;;  %685 = vset.pattern.permute.xlu1 %v721_v25  ;;  %686 = vset.pattern.permute.xlu0 %v721_v25  ;;  %v364_v27 = vpop.permute.xlu0 %363 }
  0xf1   :  { %v203_v34 = vmax.f32 %v173_v30, 0.0  ;;  %v595_v35 = vpop.f32.mrb[4].mxu0  ;;  %640 = vmatprep.subr.bf16.mxu1 %v639_v31  ;;  %456 = vperm.xlu1 %685, %v453_v24  }
  0xf2   :  { %v188_v36 = vadd.f32 %v595_v35, %v63_v29  ;;  %v182_v37 = vpop.f32.mrb[5].mxu0  ;;  %642 = vmatpush3.bf16.msra.mxu1 %v639_v31 }
  0xf3   :  { %v643_v38 = vpack.c.bf16 %v204_v33, %v203_v34  ;;  %v183_v39 = vadd.f32 %v182_v37, %v58_v32 }
  0xf4   :  { %v206_v40 = vmax.f32 %v188_v36, 0.0 }
  0xf5   :  { %v205_v42 = vmax.f32 %v183_v39, 0.0  ;;  %v598_v43 = vpop.f32.mrb[6].mxu0  ;;  %644 = vmatprep.subr.bf16.mxu1 %v643_v38 }
  0xf6   :  { %v198_v45 = vadd.f32 %v598_v43, %v73_v41  ;;  %v192_v46 = vpop.f32.mrb[7].mxu0  ;;  %646 = vmatpush3.bf16.msra.mxu1 %v643_v38 }
  0xf7   :  { %v647_v47 = vpack.c.bf16 %v206_v40, %v205_v42  ;;  %v193_v48 = vadd.f32 %v192_v46, %v68_v44 }
  0xf8   :  { %v208_v49 = vmax.f32 %v198_v45, 0.0 }
  0xf9   :  { %v207_v50 = vmax.f32 %v193_v48, 0.0  ;;  %648 = vmatprep.subr.bf16.mxu1 %v647_v47 }
  0xfa   :  { %650 = vmatpush3.bf16.msra.mxu1 %v647_v47 }
  0xfb   :  { %v651_v51 = vpack.c.bf16 %v208_v49, %v207_v50 }
  0xfd   :  { %652 = vmatprep.subr.bf16.mxu1 %v651_v51 }
  0xfe   :  { %654 = vmatpush3.bf16.msra.mxu1 %v651_v51 }
 0x101   :  { %616 = vmatmul.mubr.msk.f32.vlgmr.msra.gmra.mrb[0].mxu1 %vm241_vm2, %v210_v11 }
 0x102   :  { %618 = vmatprep.mubr.msk.f32.mxu1 %vm241_vm2, %v211_v13 }
 0x105   :  { %619 = vmatmul.mubr.msk.f32.gmra.mrb[2].mxu1 %vm241_vm2, %v212_v14  ;;  %v349_v14 = vpop.permute.xlu1 %348 }
 0x109   :  { %v369_v26 = vpop.permute.xlu1 %368 }
 0x170   :  { %v457_v35 = vpop.permute.xlu1 %456 }
 0x1d4   :  { %v617_v0 = vpop.f32.mrb[0].mxu1 }
 0x1d5   :  { %v322_v2 = vadd.f32 %v617_v0, %v238_v61  ;;  %v316_v3 = vpop.f32.mrb[1].mxu1 }
 0x1d6   :  { %v317_v4 = vadd.f32 %v316_v3, %v237_v63 }
 0x1d7   :  { %v352_v6 = vadd.f32 %v341_v1, %v322_v2 }
 0x1d8   :  { %v351_v8 = vadd.f32 %v337_v58, %v317_v4  ;;  %v620_v9 = vpop.f32.mrb[2].mxu1 }
 0x1d9   :  { %v356_v10 = vmax.f32 %v352_v6, 0.0  ;;  %v332_v11 = vadd.f32 %v620_v9, %v240_v5  ;;  %v326_v12 = vpop.f32.mrb[3].mxu1 }
 0x1da   :  { %v355_v13 = vmax.f32 %v351_v8, 0.0  ;;  %v327_v15 = vadd.f32 %v326_v12, %v239_v7 }
 0x1db   :  { %v354_v16 = vadd.f32 %v349_v14, %v332_v11 }
 0x1dc   :  { %v655_v17 = vpack.c.bf16 %v356_v10, %v355_v13  ;;  %v353_v18 = vadd.f32 %v345_v62, %v327_v15 }
 0x1dd   :  { %v358_v19 = vmax.f32 %v354_v16, 0.0 }
 0x1de   :  { %v357_v20 = vmax.f32 %v353_v18, 0.0  ;;  %656 = vmatprep.subr.bf16.mxu0 %v655_v17 }
 0x1df   :  { %658 = vmatpush3.bf16.msra.mxu0 %v655_v17 }
 0x1e0   :  { %v659_v21 = vpack.c.bf16 %v358_v19, %v357_v20 }
 0x1e2   :  { %660 = vmatprep.subr.bf16.mxu0 %v659_v21 }
 0x1e3   :  { %662 = vmatpush3.bf16.msra.mxu0 %v659_v21 }
 0x1e4   :  { %663 = vmatprep.subr.bf16.mxu0 %v718_v22 }
 0x1e6   :  { %630 = vmatmul.mubr.msk.f32.vlgmr.msra.gmra.mrb[8].mxu0 %vm371_vm3, %v360_v53 }
 0x1e7   :  { %636 = vmatprep.mubr.msk.f32.mxu0 %vm719_vm4, %v720_v23 }
 0x2b9   :  { %v631_v28 = vpop.f32.mrb[8].mxu0 }
 0x2ba   :  { %v448_v29 = vadd.f32 %v631_v28, %v369_v26  ;;  %v442_v30 = vpop.f32.mrb[9].mxu0 }
 0x2bb   :  { %v443_v31 = vadd.f32 %v442_v30, %v364_v27 }
 0x2bc   :  { %v452_v32 = vmax.f32 %v448_v29, 0.0 }
 0x2bd   :  { %v451_v33 = vmax.f32 %v443_v31, 0.0 }
 0x2bf   :  { %v664_v34 = vpack.c.bf16 %v452_v32, %v451_v33 }
 0x2c1   :  { %665 = vmatpush3.bf16.msra.mxu0 %v664_v34 }
 0x2c4   :  { %637 = vmatmul.mubr.msk.f32.vlgmr.msra.gmra.mrb[10].mxu0 %vm459_vm5, %v453_v24 }
 0x397   :  { %v528_v36 = vpop.f32.mrb[10].mxu0 }
 0x398   :  { %v529_v37 = vadd.f32 %v528_v36, %v457_v35  ;;  %v638_v38 = vpop.f32.mrb[11].mxu0 }
 0x39a   :  { %532 = vst [vmem:[%s774_s2] sm:$0x1] %v529_v37 }
 0x39b   :  { %537 = vsyncpa [#allocation3], 1 }

</bundles_post_ra>
